<compile_context>
chip_gen: v5e
topology: v5e:2x2
jax: 0.10.0
libtpu: 0.0.40
codegen_flags: <defaults>
</compile_context>

<pallas_src>
import functools

import jax
import jax.numpy as jnp
from jax.experimental import pallas as pl
from jax.experimental.pallas import tpu as pltpu


# -----------------------------------------------------------------------------
# Fused kernel: one image per grid step, channels-first [C, H*W] layout.
#   x_ref       : [1, Cin, H*W]
#   s1_ref,b1_ref: [Cin, 1]        folded BN1 scale / bias
#   w1s_ref     : [P, Cin]         1x1 conv weight with BN2 scale folded in
#   b2_ref      : [P, 1]           folded BN2 bias
#   w2_ref      : [G, 9*P]         3x3 conv weight, row layout (kh, kw, p)
#   o_ref       : [1, Cin+G, H*W]  (input passthrough ++ conv output)
#   patches_ref : VMEM scratch [9*P, H*W]  (im2col matrix)
# -----------------------------------------------------------------------------
def _bottleneck_kernel(x_ref, s1_ref, b1_ref, w1s_ref, b2_ref, w2_ref,
                       o_ref, patches_ref, *, H, W):
    Cin = x_ref.shape[1]
    HW = H * W

    x = x_ref[0]                                               # [Cin, HW]

    # Channel concat: pass the input straight through into the first Cin
    # channels of the output block (replaces wrapper-side torch.cat).
    o_ref[0, 0:Cin, :] = x

    # BN1 + ReLU, then 1x1 conv (BN2 scale already folded into the weight),
    # + BN2 bias, + ReLU.  H*W stays on the lane axis -> lane-dense result.
    h = jnp.maximum(x * s1_ref[...] + b1_ref[...], 0.0)        # [Cin, HW]
    y1 = jnp.dot(w1s_ref[...], h, preferred_element_type=jnp.float32)
    y1 = jnp.maximum(y1 + b2_ref[...], 0.0)                    # [P, HW]
    P = y1.shape[0]

    # ---- im2col for the 3x3 / pad=1 conv ------------------------------------
    # A tap offset (dh, dw) is a shift of dh*W+dw along the flattened spatial
    # axis (XLU lane roll); out-of-image reads (the zero padding) are masked.
    col = jax.lax.broadcasted_iota(jnp.int32, (1, HW), 1)      # flattened idx
    jcol = col % W                                             # column within row
    for dh in (-1, 0, 1):
        for dw in (-1, 0, 1):
            off = dh * W + dw
            idx = (dh + 1) * 3 + (dw + 1)                      # = kh*3 + kw
            tap = y1 if off == 0 else pltpu.roll(y1, (-off) % HW, axis=1)
            conds = []
            if dh == -1:
                conds.append(col >= W)                         # i + dh >= 0
            elif dh == 1:
                conds.append(col < (H - 1) * W)                # i + dh <= H-1
            if dw == -1:
                conds.append(jcol >= 1)                        # j + dw >= 0
            elif dw == 1:
                conds.append(jcol <= W - 2)                    # j + dw <= W-1
            if conds:
                m = conds[0]
                for c in conds[1:]:
                    m = jnp.logical_and(m, c)
                tap = jnp.where(m, tap, 0.0)
            patches_ref[idx * P:(idx + 1) * P, :] = tap

    # Single K = 9*P matmul; output [G, HW] is channels-first and lane-dense.
    y2 = jnp.dot(w2_ref[...], patches_ref[...],
                 preferred_element_type=jnp.float32)
    o_ref[0, Cin:, :] = y2.astype(o_ref.dtype)


# -----------------------------------------------------------------------------
# Wrapper
# -----------------------------------------------------------------------------
def _fold_bn(gamma, beta, mean, var, eps):
    scale = gamma / jnp.sqrt(var + eps)
    bias = beta - mean * scale
    return scale, bias


@jax.jit
def bottleneck_forward(x_nchw, params):
    """DenseNet Bottleneck forward.

    x_nchw: [N, Cin, H, W] float32.
    params:
      bn{1,2}_{gamma,beta,mean,var}
      w1: [P, Cin]      (PyTorch conv1.weight[:, :, 0, 0])
      w2: [G, P, 3, 3]  (PyTorch conv2.weight, OIHW, as-is)
    returns [N, Cin + G, H, W].
    """
    eps = 1e-5                       # nn.BatchNorm2d default
    N, Cin, H, W = x_nchw.shape
    w1 = params["w1"]
    w2 = params["w2"]
    P = w1.shape[0]
    G = w2.shape[0]
    HW = H * W
    Cout = Cin + G

    s1, b1 = _fold_bn(params["bn1_gamma"], params["bn1_beta"],
                      params["bn1_mean"], params["bn1_var"], eps)
    s2, b2 = _fold_bn(params["bn2_gamma"], params["bn2_beta"],
                      params["bn2_mean"], params["bn2_var"], eps)

    # Fold BN2 scale into the 1x1 conv weight (exact: no nonlinearity between
    # conv1 and BN2); only the BN2 bias is applied in-kernel.
    w1s = w1 * s2[:, None]                                     # [P, Cin]
    # [G, P, 3, 3] -> [G, 3, 3, P] -> [G, 9P]; row layout (kh, kw, p) matches
    # the im2col patch matrix built in-kernel.  (Tiny one-time weight prep.)
    w2_flat = jnp.transpose(w2, (0, 2, 3, 1)).reshape(G, 9 * P)

    x_flat = x_nchw.reshape(N, Cin, HW)                        # free reshape

    kernel = functools.partial(_bottleneck_kernel, H=H, W=W)
    out_flat = pl.pallas_call(
        kernel,
        out_shape=jax.ShapeDtypeStruct((N, Cout, HW), x_nchw.dtype),
        grid=(N,),
        in_specs=[
            pl.BlockSpec((1, Cin, HW), lambda n: (n, 0, 0)),   # x (one image)
            pl.BlockSpec((Cin, 1), lambda n: (0, 0)),          # BN1 scale
            pl.BlockSpec((Cin, 1), lambda n: (0, 0)),          # BN1 bias
            pl.BlockSpec((P, Cin), lambda n: (0, 0)),          # conv1 w (BN2-scaled)
            pl.BlockSpec((P, 1), lambda n: (0, 0)),            # BN2 bias
            pl.BlockSpec((G, 9 * P), lambda n: (0, 0)),        # conv2 w (im2col)
        ],
        out_specs=pl.BlockSpec((1, Cout, HW), lambda n: (n, 0, 0)),
        scratch_shapes=[pltpu.VMEM((9 * P, HW), jnp.float32)],
        compiler_params=pltpu.CompilerParams(
            dimension_semantics=("parallel",),
            vmem_limit_bytes=32 * 1024 * 1024),
    )(x_flat, s1.reshape(Cin, 1), b1.reshape(Cin, 1), w1s,
      b2.reshape(P, 1), w2_flat)

    return out_flat.reshape(N, Cout, H, W)                     # free reshape


# -----------------------------------------------------------------------------
# Pure-JAX reference (in-script sanity check)
# -----------------------------------------------------------------------------
def _reference(x_nchw, params, eps=1e-5):
    s1, b1 = _fold_bn(params["bn1_gamma"], params["bn1_beta"],
                      params["bn1_mean"], params["bn1_var"], eps)
    s2, b2 = _fold_bn(params["bn2_gamma"], params["bn2_beta"],
                      params["bn2_mean"], params["bn2_var"], eps)
    h = jnp.maximum(x_nchw * s1[None, :, None, None] + b1[None, :, None, None], 0.0)
    w1_oihw = params["w1"][:, :, None, None]                   # [P, Cin, 1, 1]
    y = jax.lax.conv_general_dilated(h, w1_oihw, (1, 1), "VALID",
                                     dimension_numbers=("NCHW", "OIHW", "NCHW"))
    y = jnp.maximum(y * s2[None, :, None, None] + b2[None, :, None, None], 0.0)
    y = jax.lax.conv_general_dilated(y, params["w2"], (1, 1), ((1, 1), (1, 1)),
                                     dimension_numbers=("NCHW", "OIHW", "NCHW"))
    return jnp.concatenate([x_nchw, y], axis=1)


# -----------------------------------------------------------------------------
# Main
# -----------------------------------------------------------------------------
if __name__ == "__main__":
    # Shapes consistent with the module: inplanes=8, expansion=4, growthRate=12
    # -> planes=48; batch=2, spatial 16x16.
    N, Cin, H, W = 2, 8, 16, 16
    expansion, growthRate = 4, 12
    P = expansion * growthRate      # 48
    G = growthRate                  # 12

    key = jax.random.PRNGKey(0)
    keys = jax.random.split(key, 10)

    params = {
        "bn1_gamma": 1.0 + 0.1 * jax.random.normal(keys[0], (Cin,), jnp.float32),
        "bn1_beta": 0.1 * jax.random.normal(keys[1], (Cin,), jnp.float32),
        "bn1_mean": 0.1 * jax.random.normal(keys[2], (Cin,), jnp.float32),
        "bn1_var": jnp.abs(1.0 + 0.1 * jax.random.normal(keys[3], (Cin,), jnp.float32)),
        "bn2_gamma": 1.0 + 0.1 * jax.random.normal(keys[4], (P,), jnp.float32),
        "bn2_beta": 0.1 * jax.random.normal(keys[5], (P,), jnp.float32),
        "bn2_mean": 0.1 * jax.random.normal(keys[6], (P,), jnp.float32),
        "bn2_var": jnp.abs(1.0 + 0.1 * jax.random.normal(keys[7], (P,), jnp.float32)),
        # conv1: [P, Cin] (1x1 weight squeezed); conv2: OIHW [G, P, 3, 3]
        "w1": 0.1 * jax.random.normal(keys[8], (P, Cin), jnp.float32),
        "w2": 0.1 * jax.random.normal(keys[9], (G, P, 3, 3), jnp.float32),
    }

    x = jax.random.normal(key, (N, Cin, H, W), jnp.float32)

    out = jax.block_until_ready(bottleneck_forward(x, params))
    assert out.shape == (N, Cin + G, H, W), out.shape

    ref = jax.block_until_ready(_reference(x, params))
    max_err = float(jnp.max(jnp.abs(out - ref)))
    assert jnp.allclose(out, ref, rtol=1e-4, atol=1e-4), max_err

    print("KERNEL_OK")
</pallas_src>

<mosaic_0001>
module attributes {stable_mosaic.version = 11 : i64} {
  func.func @_bottleneck_kernel(%arg0: i32, %arg1: memref<1x8x256xf32, #tpu.memory_space<vmem>>, %arg2: memref<8x1xf32, #tpu.memory_space<vmem>>, %arg3: memref<8x1xf32, #tpu.memory_space<vmem>>, %arg4: memref<48x8xf32, #tpu.memory_space<vmem>>, %arg5: memref<48x1xf32, #tpu.memory_space<vmem>>, %arg6: memref<12x432xf32, #tpu.memory_space<vmem>>, %arg7: memref<1x20x256xf32, #tpu.memory_space<vmem>>, %arg8: memref<432x256xf32, #tpu.memory_space<vmem>>) attributes {dimension_semantics = [#tpu.dimension_semantics<parallel>], iteration_bounds = array<i64: 2>, scalar_prefetch = 0 : i64, scratch_operands = 1 : i64, tpu.core_type = #tpu.core_type<tc>, window_params = [{transform_indices = @transform_0, window_bounds = array<i64: 1, 8, 256>}, {pipeline_mode = #tpu.pipeline_mode<synchronous>, transform_indices = @transform_1, window_bounds = array<i64: 8, 1>}, {pipeline_mode = #tpu.pipeline_mode<synchronous>, transform_indices = @transform_2, window_bounds = array<i64: 8, 1>}, {pipeline_mode = #tpu.pipeline_mode<synchronous>, transform_indices = @transform_3, window_bounds = array<i64: 48, 8>}, {pipeline_mode = #tpu.pipeline_mode<synchronous>, transform_indices = @transform_4, window_bounds = array<i64: 48, 1>}, {pipeline_mode = #tpu.pipeline_mode<synchronous>, transform_indices = @transform_5, window_bounds = array<i64: 12, 432>}, {transform_indices = @transform_6, window_bounds = array<i64: 1, 20, 256>}]} {
    %c0 = arith.constant 0 : index
    %c0_0 = arith.constant 0 : index
    %c0_1 = arith.constant 0 : index
    %0 = vector.load %arg1[%c0, %c0_0, %c0_1] : memref<1x8x256xf32, #tpu.memory_space<vmem>>, vector<1x8x256xf32>
    %1 = vector.shape_cast %0 : vector<1x8x256xf32> to vector<8x256xf32>
    %c0_2 = arith.constant 0 : index
    %c0_3 = arith.constant 0 : index
    %c0_4 = arith.constant 0 : index
    %2 = vector.load %arg7[%c0_2, %c0_3, %c0_4] : memref<1x20x256xf32, #tpu.memory_space<vmem>>, vector<1x8x256xf32>
    %3 = vector.shape_cast %2 : vector<1x8x256xf32> to vector<8x256xf32>
    %4 = vector.shape_cast %1 : vector<8x256xf32> to vector<1x8x256xf32>
    tpu.vector_store %arg7[%c0_2, %c0_3, %c0_4], %4 {strides = array<i32>} : memref<1x20x256xf32, #tpu.memory_space<vmem>>, vector<1x8x256xf32>,
    %c0_5 = arith.constant 0 : index
    %c0_6 = arith.constant 0 : index
    %5 = vector.load %arg2[%c0_5, %c0_6] : memref<8x1xf32, #tpu.memory_space<vmem>>, vector<8x1xf32>
    %6 = vector.broadcast %5 : vector<8x1xf32> to vector<8x256xf32>
    %7 = arith.mulf %1, %6 : vector<8x256xf32>
    %c0_7 = arith.constant 0 : index
    %c0_8 = arith.constant 0 : index
    %8 = vector.load %arg3[%c0_7, %c0_8] : memref<8x1xf32, #tpu.memory_space<vmem>>, vector<8x1xf32>
    %9 = vector.broadcast %8 : vector<8x1xf32> to vector<8x256xf32>
    %10 = arith.addf %7, %9 : vector<8x256xf32>
    %cst = arith.constant 0.000000e+00 : f32
    %11 = vector.broadcast %cst : f32 to vector<8x256xf32>
    %12 = arith.maximumf %10, %11 : vector<8x256xf32>
    %c0_9 = arith.constant 0 : index
    %c0_10 = arith.constant 0 : index
    %13 = vector.load %arg4[%c0_9, %c0_10] : memref<48x8xf32, #tpu.memory_space<vmem>>, vector<48x8xf32>
    %cst_11 = arith.constant dense<0.000000e+00> : vector<48x256xf32>
    %14 = tpu.matmul %13, %12, %cst_11 {dimension_numbers = #tpu.dot_dimension_numbers<[1], [0], [0], [1], [0, 0, 1, 1], [], []>} : vector<48x8xf32>, vector<8x256xf32>, vector<48x256xf32> -> vector<48x256xf32>
    %c0_12 = arith.constant 0 : index
    %c0_13 = arith.constant 0 : index
    %15 = vector.load %arg5[%c0_12, %c0_13] : memref<48x1xf32, #tpu.memory_space<vmem>>, vector<48x1xf32>
    %16 = vector.broadcast %15 : vector<48x1xf32> to vector<48x256xf32>
    %17 = arith.addf %14, %16 : vector<48x256xf32>
    %cst_14 = arith.constant 0.000000e+00 : f32
    %18 = vector.broadcast %cst_14 : f32 to vector<48x256xf32>
    %19 = arith.maximumf %17, %18 : vector<48x256xf32>
    %20 = tpu.iota {dimensions = array<i32: 1>} : vector<1x256xi32>
    %c16_i32 = arith.constant 16 : i32
    %c0_i32 = arith.constant 0 : i32
    %21 = arith.cmpi eq, %c16_i32, %c0_i32 : i32
    %c1_i32 = arith.constant 1 : i32
    %22 = arith.select %21, %c1_i32, %c16_i32 : i32
    %23 = vector.broadcast %22 : i32 to vector<1x256xi32>
    %24 = arith.remsi %20, %23 : vector<1x256xi32>
    %c0_i32_15 = arith.constant 0 : i32
    %25 = vector.broadcast %c0_i32_15 : i32 to vector<1x256xi32>
    %26 = arith.cmpi ne, %24, %25 : vector<1x256xi32>
    %c0_i32_16 = arith.constant 0 : i32
    %27 = vector.broadcast %c0_i32_16 : i32 to vector<1x256xi32>
    %28 = arith.cmpi slt, %24, %27 : vector<1x256xi32>
    %c0_i32_17 = arith.constant 0 : i32
    %29 = arith.cmpi slt, %22, %c0_i32_17 : i32
    %30 = vector.broadcast %29 : i1 to vector<1x256xi1>
    %31 = vector.broadcast %30 : vector<1x256xi1> to vector<1x256xi1>
    %32 = arith.xori %28, %31 : vector<1x256xi1>
    %33 = arith.andi %32, %26 : vector<1x256xi1>
    %34 = vector.broadcast %22 : i32 to vector<1x256xi32>
    %35 = arith.addi %24, %34 : vector<1x256xi32>
    %36 = arith.select %33, %35, %24 : vector<1x256xi1>, vector<1x256xi32>
    %c17_i32 = arith.constant 17 : i32
    %37 = tpu.dynamic_rotate %19 by %c17_i32 dim 1 : vector<48x256xf32>, i32 -> vector<48x256xf32>
    %c16_i32_18 = arith.constant 16 : i32
    %38 = vector.broadcast %c16_i32_18 : i32 to vector<1x256xi32>
    %39 = arith.cmpi sge, %20, %38 : vector<1x256xi32>
    %c1_i32_19 = arith.constant 1 : i32
    %40 = vector.broadcast %c1_i32_19 : i32 to vector<1x256xi32>
    %41 = arith.cmpi sge, %36, %40 : vector<1x256xi32>
    %42 = arith.andi %39, %41 : vector<1x256xi1>
    %cst_20 = arith.constant 0.000000e+00 : f32
    %43 = vector.shape_cast %42 : vector<1x256xi1> to vector<1x256xi1>
    %44 = vector.broadcast %43 : vector<1x256xi1> to vector<48x256xi1>
    %45 = vector.broadcast %cst_20 : f32 to vector<48x256xf32>
    %46 = arith.select %44, %37, %45 : vector<48x256xi1>, vector<48x256xf32>
    %c0_21 = arith.constant 0 : index
    %c0_22 = arith.constant 0 : index
    %47 = vector.load %arg8[%c0_21, %c0_22] : memref<432x256xf32, #tpu.memory_space<vmem>>, vector<48x256xf32>
    tpu.vector_store %arg8[%c0_21, %c0_22], %46 {strides = array<i32>} : memref<432x256xf32, #tpu.memory_space<vmem>>, vector<48x256xf32>,
    %c16_i32_23 = arith.constant 16 : i32
    %48 = tpu.dynamic_rotate %19 by %c16_i32_23 dim 1 : vector<48x256xf32>, i32 -> vector<48x256xf32>
    %c16_i32_24 = arith.constant 16 : i32
    %49 = vector.broadcast %c16_i32_24 : i32 to vector<1x256xi32>
    %50 = arith.cmpi sge, %20, %49 : vector<1x256xi32>
    %cst_25 = arith.constant 0.000000e+00 : f32
    %51 = vector.shape_cast %50 : vector<1x256xi1> to vector<1x256xi1>
    %52 = vector.broadcast %51 : vector<1x256xi1> to vector<48x256xi1>
    %53 = vector.broadcast %cst_25 : f32 to vector<48x256xf32>
    %54 = arith.select %52, %48, %53 : vector<48x256xi1>, vector<48x256xf32>
    %c48 = arith.constant 48 : index
    %c0_26 = arith.constant 0 : index
    %55 = vector.load %arg8[%c48, %c0_26] : memref<432x256xf32, #tpu.memory_space<vmem>>, vector<48x256xf32>
    tpu.vector_store %arg8[%c48, %c0_26], %54 {strides = array<i32>} : memref<432x256xf32, #tpu.memory_space<vmem>>, vector<48x256xf32>,
    %c15_i32 = arith.constant 15 : i32
    %56 = tpu.dynamic_rotate %19 by %c15_i32 dim 1 : vector<48x256xf32>, i32 -> vector<48x256xf32>
    %c16_i32_27 = arith.constant 16 : i32
    %57 = vector.broadcast %c16_i32_27 : i32 to vector<1x256xi32>
    %58 = arith.cmpi sge, %20, %57 : vector<1x256xi32>
    %c14_i32 = arith.constant 14 : i32
    %59 = vector.broadcast %c14_i32 : i32 to vector<1x256xi32>
    %60 = arith.cmpi sle, %36, %59 : vector<1x256xi32>
    %61 = arith.andi %58, %60 : vector<1x256xi1>
    %cst_28 = arith.constant 0.000000e+00 : f32
    %62 = vector.shape_cast %61 : vector<1x256xi1> to vector<1x256xi1>
    %63 = vector.broadcast %62 : vector<1x256xi1> to vector<48x256xi1>
    %64 = vector.broadcast %cst_28 : f32 to vector<48x256xf32>
    %65 = arith.select %63, %56, %64 : vector<48x256xi1>, vector<48x256xf32>
    %c96 = arith.constant 96 : index
    %c0_29 = arith.constant 0 : index
    %66 = vector.load %arg8[%c96, %c0_29] : memref<432x256xf32, #tpu.memory_space<vmem>>, vector<48x256xf32>
    tpu.vector_store %arg8[%c96, %c0_29], %65 {strides = array<i32>} : memref<432x256xf32, #tpu.memory_space<vmem>>, vector<48x256xf32>,
    %c1_i32_30 = arith.constant 1 : i32
    %67 = tpu.dynamic_rotate %19 by %c1_i32_30 dim 1 : vector<48x256xf32>, i32 -> vector<48x256xf32>
    %c1_i32_31 = arith.constant 1 : i32
    %68 = vector.broadcast %c1_i32_31 : i32 to vector<1x256xi32>
    %69 = arith.cmpi sge, %36, %68 : vector<1x256xi32>
    %cst_32 = arith.constant 0.000000e+00 : f32
    %70 = vector.shape_cast %69 : vector<1x256xi1> to vector<1x256xi1>
    %71 = vector.broadcast %70 : vector<1x256xi1> to vector<48x256xi1>
    %72 = vector.broadcast %cst_32 : f32 to vector<48x256xf32>
    %73 = arith.select %71, %67, %72 : vector<48x256xi1>, vector<48x256xf32>
    %c144 = arith.constant 144 : index
    %c0_33 = arith.constant 0 : index
    %74 = vector.load %arg8[%c144, %c0_33] : memref<432x256xf32, #tpu.memory_space<vmem>>, vector<48x256xf32>
    tpu.vector_store %arg8[%c144, %c0_33], %73 {strides = array<i32>} : memref<432x256xf32, #tpu.memory_space<vmem>>, vector<48x256xf32>,
    %c192 = arith.constant 192 : index
    %c0_34 = arith.constant 0 : index
    %75 = vector.load %arg8[%c192, %c0_34] : memref<432x256xf32, #tpu.memory_space<vmem>>, vector<48x256xf32>
    tpu.vector_store %arg8[%c192, %c0_34], %19 {strides = array<i32>} : memref<432x256xf32, #tpu.memory_space<vmem>>, vector<48x256xf32>,
    %c255_i32 = arith.constant 255 : i32
    %76 = tpu.dynamic_rotate %19 by %c255_i32 dim 1 : vector<48x256xf32>, i32 -> vector<48x256xf32>
    %c14_i32_35 = arith.constant 14 : i32
    %77 = vector.broadcast %c14_i32_35 : i32 to vector<1x256xi32>
    %78 = arith.cmpi sle, %36, %77 : vector<1x256xi32>
    %cst_36 = arith.constant 0.000000e+00 : f32
    %79 = vector.shape_cast %78 : vector<1x256xi1> to vector<1x256xi1>
    %80 = vector.broadcast %79 : vector<1x256xi1> to vector<48x256xi1>
    %81 = vector.broadcast %cst_36 : f32 to vector<48x256xf32>
    %82 = arith.select %80, %76, %81 : vector<48x256xi1>, vector<48x256xf32>
    %c240 = arith.constant 240 : index
    %c0_37 = arith.constant 0 : index
    %83 = vector.load %arg8[%c240, %c0_37] : memref<432x256xf32, #tpu.memory_space<vmem>>, vector<48x256xf32>
    tpu.vector_store %arg8[%c240, %c0_37], %82 {strides = array<i32>} : memref<432x256xf32, #tpu.memory_space<vmem>>, vector<48x256xf32>,
    %c241_i32 = arith.constant 241 : i32
    %84 = tpu.dynamic_rotate %19 by %c241_i32 dim 1 : vector<48x256xf32>, i32 -> vector<48x256xf32>
    %c240_i32 = arith.constant 240 : i32
    %85 = vector.broadcast %c240_i32 : i32 to vector<1x256xi32>
    %86 = arith.cmpi slt, %20, %85 : vector<1x256xi32>
    %c1_i32_38 = arith.constant 1 : i32
    %87 = vector.broadcast %c1_i32_38 : i32 to vector<1x256xi32>
    %88 = arith.cmpi sge, %36, %87 : vector<1x256xi32>
    %89 = arith.andi %86, %88 : vector<1x256xi1>
    %cst_39 = arith.constant 0.000000e+00 : f32
    %90 = vector.shape_cast %89 : vector<1x256xi1> to vector<1x256xi1>
    %91 = vector.broadcast %90 : vector<1x256xi1> to vector<48x256xi1>
    %92 = vector.broadcast %cst_39 : f32 to vector<48x256xf32>
    %93 = arith.select %91, %84, %92 : vector<48x256xi1>, vector<48x256xf32>
    %c288 = arith.constant 288 : index
    %c0_40 = arith.constant 0 : index
    %94 = vector.load %arg8[%c288, %c0_40] : memref<432x256xf32, #tpu.memory_space<vmem>>, vector<48x256xf32>
    tpu.vector_store %arg8[%c288, %c0_40], %93 {strides = array<i32>} : memref<432x256xf32, #tpu.memory_space<vmem>>, vector<48x256xf32>,
    %c240_i32_41 = arith.constant 240 : i32
    %95 = tpu.dynamic_rotate %19 by %c240_i32_41 dim 1 : vector<48x256xf32>, i32 -> vector<48x256xf32>
    %c240_i32_42 = arith.constant 240 : i32
    %96 = vector.broadcast %c240_i32_42 : i32 to vector<1x256xi32>
    %97 = arith.cmpi slt, %20, %96 : vector<1x256xi32>
    %cst_43 = arith.constant 0.000000e+00 : f32
    %98 = vector.shape_cast %97 : vector<1x256xi1> to vector<1x256xi1>
    %99 = vector.broadcast %98 : vector<1x256xi1> to vector<48x256xi1>
    %100 = vector.broadcast %cst_43 : f32 to vector<48x256xf32>
    %101 = arith.select %99, %95, %100 : vector<48x256xi1>, vector<48x256xf32>
    %c336 = arith.constant 336 : index
    %c0_44 = arith.constant 0 : index
    %102 = vector.load %arg8[%c336, %c0_44] : memref<432x256xf32, #tpu.memory_space<vmem>>, vector<48x256xf32>
    tpu.vector_store %arg8[%c336, %c0_44], %101 {strides = array<i32>} : memref<432x256xf32, #tpu.memory_space<vmem>>, vector<48x256xf32>,
    %c239_i32 = arith.constant 239 : i32
    %103 = tpu.dynamic_rotate %19 by %c239_i32 dim 1 : vector<48x256xf32>, i32 -> vector<48x256xf32>
    %c240_i32_45 = arith.constant 240 : i32
    %104 = vector.broadcast %c240_i32_45 : i32 to vector<1x256xi32>
    %105 = arith.cmpi slt, %20, %104 : vector<1x256xi32>
    %c14_i32_46 = arith.constant 14 : i32
    %106 = vector.broadcast %c14_i32_46 : i32 to vector<1x256xi32>
    %107 = arith.cmpi sle, %36, %106 : vector<1x256xi32>
    %108 = arith.andi %105, %107 : vector<1x256xi1>
    %cst_47 = arith.constant 0.000000e+00 : f32
    %109 = vector.shape_cast %108 : vector<1x256xi1> to vector<1x256xi1>
    %110 = vector.broadcast %109 : vector<1x256xi1> to vector<48x256xi1>
    %111 = vector.broadcast %cst_47 : f32 to vector<48x256xf32>
    %112 = arith.select %110, %103, %111 : vector<48x256xi1>, vector<48x256xf32>
    %c384 = arith.constant 384 : index
    %c0_48 = arith.constant 0 : index
    %113 = vector.load %arg8[%c384, %c0_48] : memref<432x256xf32, #tpu.memory_space<vmem>>, vector<48x256xf32>
    tpu.vector_store %arg8[%c384, %c0_48], %112 {strides = array<i32>} : memref<432x256xf32, #tpu.memory_space<vmem>>, vector<48x256xf32>,
    %c0_49 = arith.constant 0 : index
    %c0_50 = arith.constant 0 : index
    %114 = vector.load %arg6[%c0_49, %c0_50] : memref<12x432xf32, #tpu.memory_space<vmem>>, vector<12x432xf32>
    %c0_51 = arith.constant 0 : index
    %c0_52 = arith.constant 0 : index
    %115 = vector.load %arg8[%c0_51, %c0_52] : memref<432x256xf32, #tpu.memory_space<vmem>>, vector<432x256xf32>
    %cst_53 = arith.constant dense<0.000000e+00> : vector<12x256xf32>
    %116 = tpu.matmul %114, %115, %cst_53 {dimension_numbers = #tpu.dot_dimension_numbers<[1], [0], [0], [1], [0, 0, 1, 1], [], []>} : vector<12x432xf32>, vector<432x256xf32>, vector<12x256xf32> -> vector<12x256xf32>
    %c0_54 = arith.constant 0 : index
    %c8 = arith.constant 8 : index
    %c0_55 = arith.constant 0 : index
    %117 = vector.load %arg7[%c0_54, %c8, %c0_55] : memref<1x20x256xf32, #tpu.memory_space<vmem>>, vector<1x12x256xf32>
    %118 = vector.shape_cast %117 : vector<1x12x256xf32> to vector<12x256xf32>
    %119 = vector.shape_cast %116 : vector<12x256xf32> to vector<1x12x256xf32>
    tpu.vector_store %arg7[%c0_54, %c8, %c0_55], %119 {strides = array<i32>} : memref<1x20x256xf32, #tpu.memory_space<vmem>>, vector<1x12x256xf32>,
    return
  }
  func.func @transform_0(%arg0: i32) -> (i32, i32, i32) {
    %c0_i32 = arith.constant 0 : i32
    %c0_i32_0 = arith.constant 0 : i32
    %c0_i32_1 = arith.constant 0 : i32
    return %arg0, %c0_i32, %c0_i32_0 : i32, i32, i32
  }
  func.func @transform_1(%arg0: i32) -> (i32, i32) {
    %c0_i32 = arith.constant 0 : i32
    %c0_i32_0 = arith.constant 0 : i32
    %c0_i32_1 = arith.constant 0 : i32
    return %c0_i32, %c0_i32_0 : i32, i32
  }
  func.func @transform_2(%arg0: i32) -> (i32, i32) {
    %c0_i32 = arith.constant 0 : i32
    %c0_i32_0 = arith.constant 0 : i32
    %c0_i32_1 = arith.constant 0 : i32
    return %c0_i32, %c0_i32_0 : i32, i32
  }
  func.func @transform_3(%arg0: i32) -> (i32, i32) {
    %c0_i32 = arith.constant 0 : i32
    %c0_i32_0 = arith.constant 0 : i32
    %c0_i32_1 = arith.constant 0 : i32
    return %c0_i32, %c0_i32_0 : i32, i32
  }
  func.func @transform_4(%arg0: i32) -> (i32, i32) {
    %c0_i32 = arith.constant 0 : i32
    %c0_i32_0 = arith.constant 0 : i32
    %c0_i32_1 = arith.constant 0 : i32
    return %c0_i32, %c0_i32_0 : i32, i32
  }
  func.func @transform_5(%arg0: i32) -> (i32, i32) {
    %c0_i32 = arith.constant 0 : i32
    %c0_i32_0 = arith.constant 0 : i32
    %c0_i32_1 = arith.constant 0 : i32
    return %c0_i32, %c0_i32_0 : i32, i32
  }
  func.func @transform_6(%arg0: i32) -> (i32, i32, i32) {
    %c0_i32 = arith.constant 0 : i32
    %c0_i32_0 = arith.constant 0 : i32
    %c0_i32_1 = arith.constant 0 : i32
    return %arg0, %c0_i32, %c0_i32_0 : i32, i32, i32
  }
}

</mosaic_0001>

<bundles_post_ra>
// kernel: bottleneck_forward.1
= control target key start
LH: loop header
LB: loop body
LE: loop exit
PB: predicated region body
PF: predicated region fallthrough
CT: control target
= control target key end

     0   :  { %s1544_s21 = smov 0   ;;  %s2573_s0 = inlined_call_operand.vmem [shape: f32[2,8,256], index: 0, kind: input, shape index: {}]   ;;  %s2574_s1 = inlined_call_operand.vmem [shape: f32[8,1], index: 1, kind: input, shape index: {}]   ;;  %s2575_s2 = inlined_call_operand.vmem [shape: f32[8,1], index: 2, kind: input, shape index: {}]   ;;  %s2576_s3 = inlined_call_operand.vmem [shape: f32[48,8], index: 3, kind: input, shape index: {}]   ;;  %s2577_s4 = inlined_call_operand.vmem [shape: f32[48,1], index: 4, kind: input, shape index: {}]   ;;  %s2578_s5 = inlined_call_operand.vmem [shape: f32[12,432], index: 5, kind: input, shape index: {}]   ;;  %s2579_s6 = inlined_call_operand.vmem [shape: f32[2,20,256], index: 6, kind: output, shape index: {}]  }
   0x1 LB: > { %s1358_s22 = sadd.s32 4294967295, %s1498_s21   ;;  %p1362_p0 = scmp.ge.s32.totalorder %s1498_s21, 1  ;;  %s1498_s21 = sphi %s1544_s21, %s16_s21  }
   0x2   : > { %p212_p1 = scmp.lt.s32.totalorder %s1498_s21, 3 }
   0x4   : > { %p213_p2 = pnand %p1362_p0, %p212_p1 }
   0x6   : > { %216 = sbr.rel (%p213_p2) target bundleno = 787 (0x313), region = 44 }
   0xb   : > { %v256_v0 = vld [vmem:[%s2574_s1] sm:$0xff]  ;;  %v1500_v1 = vmov 0   ;;  %p242_p3 = scmp.lt.s32.totalorder %s1358_s22, 1  ;;  %v281_v7 = vld [vmem:[%s2577_s4 + $0x8] sm:$0xff]  ;;  %vm316_vm0 = vcmask 64512   ;;  %v276_v21 = vld [vmem:[%s2576_s3 + $0x10] sm:$0xff]  ;;  %v417_v55 = vlaneseq }
   0xc   : > { %1489 = vset.pattern.permute.xlu0 %v1500_v1  ;;  %1490 = vset.pattern.permute.xlu1 %v1500_v1  ;;  %v264_v2 = vld [vmem:[%s2575_s2] sm:$0xff]  ;;  %v285_v8 = vld [vmem:[%s2577_s4 + $0x28] sm:$0xff]  ;;  %v277_v22 = vld [vmem:[%s2576_s3 + $0x18] sm:$0xff]  ;;  %s1501_s13 = smov 15   ;;  %s1502_s14 = smov 17  }
   0xd   : > { %259 = vperm.xlu0 %1489, %v256_v0   ;;  %1491 = vset.pattern.permute.xlu2 %v1500_v1  ;;  %v284_v3 = vld [vmem:[%s2577_s4 + $0x20] sm:$0xff]  ;;  %s2649_s22 = smov (!%p242_p3, %s1358_s22), 1  ;;  %v275_v19 = vld [vmem:[%s2576_s3 + $0x8] sm:$0xff]  ;;  %v282_v23 = vld [vmem:[%s2577_s4 + $0x10] sm:$0xff]  ;;  %s1503_s15 = smov 127   ;;  %v1706_v57 = vand.u32 127, %v417_v55 }
   0xe   : > { %s1384_s29 = sshll.u32 %s2649_s22, 4  ;;  %s1471_s30 = smul.u32 48, %s2649_s22  ;;  %v280_v6 = vld [vmem:[%s2577_s4] sm:$0xff]  ;;  %v279_v20 = vld [vmem:[%s2576_s3 + $0x28] sm:$0xff]  ;;  %298 = vperm.xlu2 %1491, %v282_v23   ;;  %v283_v24 = vld [vmem:[%s2577_s4 + $0x18] sm:$0xff] }
   0xf   : > { %s246_s9 = scalar_lea.vmem %s2573_s0, %s1384_s29  ;;  %288 = vperm.xlu1 %1490, %v280_v6   ;;  %v274_v17 = vld [vmem:[%s2576_s3] sm:$0xff]  ;;  %s1504_s16 = smov 112   ;;  %vm468_vm1 = vcmp.lt.s32.totalorder %v1706_v57, 17  ;;  %vm539_vm2 = vcmp.lt.s32.totalorder %v1706_v57, 16  ;;  %vm750_vm3 = vcmp.lt.s32.totalorder %v1706_v57, 127  ;;  %vm884_vm4 = vcmp.lt.s32.totalorder %v1706_v57, 112 }
  0x10   : > { %s1567_s12 = scalar_lea.vmem %s2579_s6, %s1471_s30  ;;  %v252_v4 = vld [vmem:[%s246_s9] sm:$0xff]  ;;  %v253_v5 = vld [vmem:[%s246_s9 + $0x8] sm:$0xff]  ;;  %s1505_s17 = smov 1   ;;  %vm604_vm5 = vcmp.lt.s32.totalorder %v1706_v57, 15  ;;  %vm673_vm6 = vcmp.lt.s32.totalorder %v1706_v57, 1  ;;  %vm815_vm7 = vcmp.lt.s32.totalorder %v1706_v57, 113 }
  0x11   : > { %254 = vst [vmem:[%s1567_s12] sm:$0xff] %v252_v4  ;;  %v278_v18 = vld [vmem:[%s2576_s3 + $0x20] sm:$0xff]  ;;  %s1506_s18 = smov 16   ;;  %s1507_s19 = smov 113   ;;  %vm481_vm10 = vcmp.ge.s32.totalorder %v1706_v57, 16 }
  0x12   : > { %255 = vst [vmem:[%s1567_s12 + $0x8] sm:$0xff] %v253_v5  ;;  %s1508_s20 = smov 111  }
  0x15   : > { %267 = vperm.xlu0 %1489, %v264_v2  }
  0x16   : > { %303 = vperm.xlu2 %1491, %v283_v24  }
  0x17   : > { %293 = vperm.xlu1 %1490, %v281_v7  }
  0x1d   : > { %308 = vperm.xlu0 %1489, %v284_v3  }
  0x1f   : > { %313 = vperm.xlu1 %1490, %v285_v8  }
  0x68   : > { %v299_v50 = vpop.permute.xlu2 %298 }
  0x70   : > { %v1696_v54 = vpop.permute.xlu2 %303 }
  0x7f   : > { %v260_v9 = vpop.permute.xlu0 %259 }
  0x80   : > { %v262_v10 = vmul.f32 %v260_v9, %v252_v4  ;;  %v263_v11 = vmul.f32 %v260_v9, %v253_v5 }
  0x81   : > { %v289_v25 = vpop.permute.xlu1 %288 }
  0x87   : > { %v268_v12 = vpop.permute.xlu0 %267 }
  0x88   : > { %v270_v13 = vadd.f32 %v268_v12, %v262_v10  ;;  %v271_v14 = vadd.f32 %v268_v12, %v263_v11 }
  0x89   : > { %v294_v40 = vpop.permute.xlu1 %293 }
  0x8a   : > { %v272_v15 = vmax.f32 %v270_v13, 0.0  ;;  %v273_v16 = vmax.f32 %v271_v14, 0.0 }
  0x8c   : > { %350 = vmatpush.msra.mxu0 %v272_v15  ;;  %1469 = vmatpush.msra.mxu2 %v272_v15 }
  0x8d   : > { %385 = vmatpush.msra.mxu1 %v273_v16  ;;  %1470 = vmatpush.msra.mxu3 %v273_v16 }
  0x8e   : > { %1366 = vmatmul.msk.f32.vlgmr.msra.gmra.mxu0 %vm316_vm0, %v274_v17  ;;  %1370 = vmatmul.msk.f32.vlgmr.msra.gmra.mxu2 %vm316_vm0, %v278_v18 }
  0x8f   : > { %1372 = vmatmul.msk.f32.vlgmr.msra.gmra.mxu1 %vm316_vm0, %v274_v17  ;;  %1376 = vmatmul.msk.f32.vlgmr.msra.gmra.mxu3 %vm316_vm0, %v278_v18  ;;  %v309_v33 = vpop.permute.xlu0 %308 }
  0x91   : > { %v314_v47 = vpop.permute.xlu1 %313 }
  0x96   : > { %1367 = vmatmul.msk.f32.gmra.mxu0 %vm316_vm0, %v275_v19  ;;  %1371 = vmatmul.msk.f32.gmra.mxu2 %vm316_vm0, %v279_v20 }
  0x97   : > { %1373 = vmatmul.msk.f32.gmra.mxu1 %vm316_vm0, %v275_v19  ;;  %1377 = vmatmul.msk.f32.gmra.mxu3 %vm316_vm0, %v279_v20 }
  0x9e   : > { %1368 = vmatmul.msk.f32.gmra.mxu0 %vm316_vm0, %v276_v21 }
  0x9f   : > { %1374 = vmatmul.msk.f32.gmra.mxu1 %vm316_vm0, %v276_v21 }
  0xa6   : > { %1369 = vmatmul.msk.f32.gmra.mxu0 %vm316_vm0, %v277_v22 }
  0xa7   : > { %1375 = vmatmul.msk.f32.gmra.mxu1 %vm316_vm0, %v277_v22  ;;  %vm949_vm0 = vcmp.lt.s32.totalorder %v1706_v57, 111 }
 0x10b   : > { %v352_v26 = vpop.f32.mrf.mxu0 }
 0x10c   : > { %v353_v27 = vadd.f32 %v352_v26, %v289_v25  ;;  %v387_v28 = vpop.f32.mrf.mxu1 }
 0x10d   : > { %v388_v29 = vadd.f32 %v387_v28, %v289_v25 }
 0x10e   : > { %v1616_v30 = vmax.f32 %v353_v27, 0.0 }
 0x10f   : > { %v1618_v31 = vmax.f32 %v388_v29, 0.0 }
 0x110   : > { %580 = vrot.lane.b32.xlu1 %v1616_v30, %s1501_s13  ;;  %444 = vrot.lane.b32.xlu2 %v1616_v30, %s1502_s14 }
 0x111   : > { %2586 = vst [vmem:[#allocation3_spill] sm:$0xff] %v1618_v31  ;;  %738 = vrot.lane.b32.xlu0 %v1618_v31, %s1503_s15  ;;  %v364_v32 = vpop.f32.mrf.mxu2 }
 0x112   : > { %v365_v34 = vadd.f32 %v364_v32, %v309_v33  ;;  %v399_v36 = vpop.f32.mrf.mxu3 }
 0x113   : > { %v400_v37 = vadd.f32 %v399_v36, %v309_v33  ;;  %v355_v43 = vpop.f32.mrf.mxu0 }
 0x114   : > { %v1632_v35 = vmax.f32 %v365_v34, 0.0  ;;  %v390_v39 = vpop.f32.mrf.mxu1  ;;  %v356_v44 = vadd.f32 %v355_v43, %v294_v40 }
 0x115   : > { %v1640_v38 = vmax.f32 %v400_v37, 0.0  ;;  %v391_v41 = vadd.f32 %v390_v39, %v294_v40 }
 0x116   : > { %v1668_v45 = vmax.f32 %v356_v44, 0.0 }
 0x117   : > { %v1660_v42 = vmax.f32 %v391_v41, 0.0 }
 0x118   : > { %872 = vrot.lane.b32.xlu1 %v1618_v31, %s1504_s16  ;;  %456 = vrot.lane.b32.xlu2 %v1618_v31, %s1502_s14 }
 0x119   : > { %860 = vrot.lane.b32.xlu0 %v1616_v30, %s1504_s16  ;;  %2587 = vst [vmem:[#allocation4_spill] sm:$0xff] %v1660_v42  ;;  %v367_v46 = vpop.f32.mrf.mxu2 }
 0x11a   : > { %v368_v48 = vadd.f32 %v367_v46, %v314_v47  ;;  %v402_v51 = vpop.f32.mrf.mxu3 }
 0x11b   : > { %v403_v52 = vadd.f32 %v402_v51, %v314_v47  ;;  %v358_v3 = vpop.f32.mrf.mxu0 }
 0x11c   : > { %v1682_v49 = vmax.f32 %v368_v48, 0.0  ;;  %v359_v4 = vadd.f32 %v358_v3, %v299_v50  ;;  %v393_v13 = vpop.f32.mrf.mxu1 }
 0x11d   : > { %v1690_v53 = vmax.f32 %v403_v52, 0.0  ;;  %v394_v14 = vadd.f32 %v393_v13, %v299_v50 }
 0x11e   : > { %v1768_v12 = vmax.f32 %v359_v4, 0.0 }
 0x11f   : > { %v1785_v20 = vmax.f32 %v394_v14, 0.0 }
 0x120   : > { %649 = vrot.lane.b32.xlu1 %v1616_v30, %s1505_s17  ;;  %515 = vrot.lane.b32.xlu2 %v1616_v30, %s1506_s18 }
 0x121   : > { %452 = vrot.lane.b32.xlu0 %v1632_v35, %s1502_s14  ;;  %2588 = vst [vmem:[#allocation5_spill] sm:$0xff] %v1785_v20 }
 0x123   : > { %v361_v52 = vpop.f32.mrf.mxu0 }
 0x124   : > { %v362_v55 = vadd.f32 %v361_v52, %v1696_v54  ;;  %v396_v3 = vpop.f32.mrf.mxu1 }
 0x125   : > { %v397_v4 = vadd.f32 %v396_v3, %v1696_v54 }
 0x128   : > { %791 = vrot.lane.b32.xlu1 %v1616_v30, %s1507_s19  ;;  %527 = vrot.lane.b32.xlu2 %v1618_v31, %s1506_s18 }
 0x129   : > { %464 = vrot.lane.b32.xlu0 %v1640_v38, %s1502_s14 }
 0x130   : > { %880 = vrot.lane.b32.xlu1 %v1640_v38, %s1504_s16  ;;  %726 = vrot.lane.b32.xlu2 %v1616_v30, %s1503_s15 }
 0x131   : > { %523 = vrot.lane.b32.xlu0 %v1632_v35, %s1506_s18 }
 0x138   : > { %600 = vrot.lane.b32.xlu1 %v1640_v38, %s1501_s13  ;;  %592 = vrot.lane.b32.xlu2 %v1618_v31, %s1501_s13 }
 0x139   : > { %868 = vrot.lane.b32.xlu0 %v1632_v35, %s1504_s16 }
 0x140   : > { %740 = vrot.lane.b32.xlu1 %v1660_v42, %s1503_s15  ;;  %661 = vrot.lane.b32.xlu2 %v1618_v31, %s1505_s17 }
 0x141   : > { %669 = vrot.lane.b32.xlu0 %v1640_v38, %s1505_s17 }
 0x148   : > { %862 = vrot.lane.b32.xlu1 %v1668_v45, %s1504_s16  ;;  %803 = vrot.lane.b32.xlu2 %v1618_v31, %s1507_s19 }
 0x149   : > { %811 = vrot.lane.b32.xlu0 %v1640_v38, %s1507_s19 }
 0x150   : > { %663 = vrot.lane.b32.xlu1 %v1660_v42, %s1505_s17  ;;  %535 = vrot.lane.b32.xlu2 %v1640_v38, %s1506_s18 }
 0x151   : > { %588 = vrot.lane.b32.xlu0 %v1632_v35, %s1501_s13 }
 0x158   : > { %454 = vrot.lane.b32.xlu1 %v1682_v49, %s1502_s14  ;;  %657 = vrot.lane.b32.xlu2 %v1632_v35, %s1505_s17 }
 0x159   : > { %746 = vrot.lane.b32.xlu0 %v1640_v38, %s1503_s15 }
 0x160   : > { %466 = vrot.lane.b32.xlu1 %v1690_v53, %s1502_s14  ;;  %799 = vrot.lane.b32.xlu2 %v1632_v35, %s1507_s19 }
 0x161   : > { %446 = vrot.lane.b32.xlu0 %v1668_v45, %s1502_s14 }
 0x168   : > { %525 = vrot.lane.b32.xlu1 %v1682_v49, %s1506_s18  ;;  %734 = vrot.lane.b32.xlu2 %v1632_v35, %s1503_s15 }
 0x169   : > { %458 = vrot.lane.b32.xlu0 %v1660_v42, %s1502_s14 }
 0x16a   : > { %v445_v56 = vpop.permute.xlu2 %444 }
 0x170   : > { %882 = vrot.lane.b32.xlu1 %v1690_v53, %s1504_s16  ;;  %582 = vrot.lane.b32.xlu2 %v1668_v45, %s1501_s13 }
 0x171   : > { %517 = vrot.lane.b32.xlu0 %v1668_v45, %s1506_s18 }
 0x172   : > { %v457_v58 = vpop.permute.xlu2 %456 }
 0x173   : > { %v1717_v59 = vsel %vm468_vm1, %v457_v58, %v445_v56  ;;  %v1721_v60 = vsel %vm468_vm1, %v445_v56, %v457_v58 }
 0x178   : > { %671 = vrot.lane.b32.xlu1 %v1690_v53, %s1505_s17  ;;  %874 = vrot.lane.b32.xlu2 %v1660_v42, %s1504_s16 }
 0x179   : > { %728 = vrot.lane.b32.xlu0 %v1668_v45, %s1503_s15 }
 0x17a   : > { %v516_v61 = vpop.permute.xlu2 %515 }
 0x180   : > { %801 = vrot.lane.b32.xlu1 %v1682_v49, %s1507_s19  ;;  %793 = vrot.lane.b32.xlu2 %v1668_v45, %s1507_s19 }
 0x181   : > { %594 = vrot.lane.b32.xlu0 %v1660_v42, %s1501_s13 }
 0x182   : > { %v581_v62 = vpop.permute.xlu1 %580  ;;  %v528_v63 = vpop.permute.xlu2 %527 }
 0x183   : > { %v739_v0 = vpop.permute.xlu0 %738  ;;  %v1738_v1 = vsel %vm539_vm2, %v528_v63, %v516_v61  ;;  %v1742_v2 = vsel %vm539_vm2, %v516_v61, %v528_v63 }
 0x188   : > { %748 = vrot.lane.b32.xlu1 %v1690_v53, %s1503_s15  ;;  %537 = vrot.lane.b32.xlu2 %v1690_v53, %s1506_s18 }
 0x189   : > { %529 = vrot.lane.b32.xlu0 %v1660_v42, %s1506_s18 }
 0x18a   : > { %v873_v5 = vpop.permute.xlu1 %872  ;;  %v727_v6 = vpop.permute.xlu2 %726 }
 0x18b   : > { %v861_v7 = vpop.permute.xlu0 %860  ;;  %v1754_v8 = vsel %vm750_vm3, %v739_v0, %v727_v6  ;;  %v1758_v9 = vsel %vm750_vm3, %v727_v6, %v739_v0  ;;  %v1878_v0 = vmax.f32 %v362_v55, 0.0 }
 0x18c   : > { %v1762_v10 = vsel %vm884_vm4, %v873_v5, %v861_v7  ;;  %v1766_v11 = vsel %vm884_vm4, %v861_v7, %v873_v5 }
 0x190   : > { %448 = vrot.lane.b32.xlu1 %v1768_v12, %s1502_s14  ;;  %813 = vrot.lane.b32.xlu2 %v1690_v53, %s1507_s19 }
 0x191   : > { %651 = vrot.lane.b32.xlu0 %v1668_v45, %s1505_s17 }
 0x192   : > { %v650_v15 = vpop.permute.xlu1 %649  ;;  %v593_v16 = vpop.permute.xlu2 %592 }
 0x193   : > { %v453_v17 = vpop.permute.xlu0 %452  ;;  %v1779_v18 = vsel %vm604_vm5, %v593_v16, %v581_v62  ;;  %v1783_v19 = vsel %vm604_vm5, %v581_v62, %v593_v16 }
 0x198   : > { %460 = vrot.lane.b32.xlu1 %v1785_v20, %s1502_s14  ;;  %590 = vrot.lane.b32.xlu2 %v1682_v49, %s1501_s13 }
 0x199   : > { %805 = vrot.lane.b32.xlu0 %v1660_v42, %s1507_s19 }
 0x19a   : > { %v792_v21 = vpop.permute.xlu1 %791  ;;  %v662_v22 = vpop.permute.xlu2 %661 }
 0x19b   : > { %v465_v23 = vpop.permute.xlu0 %464  ;;  %v1796_v24 = vsel %vm673_vm6, %v650_v15, %v662_v22  ;;  %v1800_v25 = vsel %vm673_vm6, %v662_v22, %v650_v15  ;;  %v1897_v15 = vmax.f32 %v397_v4, 0.0 }
 0x19c   : > { %2589 = vst [vmem:[#allocation6_spill] sm:$0xff] %v1796_v24  ;;  %v1804_v26 = vsel %vm468_vm1, %v465_v23, %v453_v17  ;;  %v1808_v27 = vsel %vm468_vm1, %v453_v17, %v465_v23 }
 0x19d   : > { %2595 = vst [vmem:[#allocation12_spill] sm:$0xff] %v1897_v15 }
 0x1a0   : > { %519 = vrot.lane.b32.xlu1 %v1768_v12, %s1506_s18  ;;  %935 = vrot.lane.b32.xlu2 %v1682_v49, %s1508_s20 }
 0x1a1   : > { %870 = vrot.lane.b32.xlu0 %v1682_v49, %s1504_s16 }
 0x1a2   : > { %v881_v28 = vpop.permute.xlu1 %880  ;;  %v804_v29 = vpop.permute.xlu2 %803 }
 0x1a3   : > { %v524_v32 = vpop.permute.xlu0 %523  ;;  %v1819_v33 = vsel %vm815_vm7, %v804_v29, %v792_v21  ;;  %v1823_v34 = vsel %vm815_vm7, %v792_v21, %v804_v29 }
 0x1a4   : > { %2590 = vst [vmem:[#allocation7_spill] sm:$0xff] %v1819_v33 }
 0x1a5   : > { %2591 = vst [vmem:[#allocation8_spill] sm:$0xff] %v1823_v34  ;;  %v2140_v34 = vadd.s32 128, %v1706_v57 }
 0x1a7   : > { %vm829_vm15 = vcmp.lt.s32.totalorder %v2140_v34, 240 }
 0x1a8   : > { %596 = vrot.lane.b32.xlu1 %v1785_v20, %s1501_s13  ;;  %864 = vrot.lane.b32.xlu2 %v1768_v12, %s1504_s16 }
 0x1a9   : > { %659 = vrot.lane.b32.xlu0 %v1682_v49, %s1505_s17 }
 0x1aa   : > { %v601_v36 = vpop.permute.xlu1 %600  ;;  %v536_v37 = vpop.permute.xlu2 %535 }
 0x1ab   : > { %v869_v39 = vpop.permute.xlu0 %868  ;;  %v1833_v40 = vsel %vm539_vm2, %v536_v37, %v524_v32  ;;  %v1837_v41 = vsel %vm539_vm2, %v524_v32, %v536_v37 }
 0x1ac   : > { %v1841_v43 = vsel %vm884_vm4, %v881_v28, %v869_v39  ;;  %v1845_v44 = vsel %vm884_vm4, %v869_v39, %v881_v28 }
 0x1b0   : > { %531 = vrot.lane.b32.xlu1 %v1785_v20, %s1506_s18  ;;  %653 = vrot.lane.b32.xlu2 %v1768_v12, %s1505_s17 }
 0x1b1   : > { %602 = vrot.lane.b32.xlu0 %v1690_v53, %s1501_s13 }
 0x1b2   : > { %v1853_v46 = vpop.permute.xlu1 %740  ;;  %v658_v47 = vpop.permute.xlu2 %657 }
 0x1b3   : > { %v670_v48 = vpop.permute.xlu0 %669 }
 0x1b4   : > { %v1857_v50 = vsel %vm673_vm6, %v658_v47, %v670_v48  ;;  %v1861_v51 = vsel %vm673_vm6, %v670_v48, %v658_v47 }
 0x1b5   : > { %2592 = vst [vmem:[#allocation9_spill] sm:$0xff] %v1857_v50 }
 0x1b8   : > { %795 = vrot.lane.b32.xlu1 %v1768_v12, %s1507_s19  ;;  %807 = vrot.lane.b32.xlu2 %v1785_v20, %s1507_s19 }
 0x1b9   : > { %736 = vrot.lane.b32.xlu0 %v1682_v49, %s1503_s15 }
 0x1ba   : > { %v863_v56 = vpop.permute.xlu1 %862  ;;  %v800_v58 = vpop.permute.xlu2 %799 }
 0x1bb   : > { %v812_v61 = vpop.permute.xlu0 %811 }
 0x1bc   : > { %v1872_v62 = vsel %vm815_vm7, %v812_v61, %v800_v58  ;;  %v1876_v63 = vsel %vm815_vm7, %v800_v58, %v812_v61 }
 0x1bd   : > { %2593 = vst [vmem:[#allocation10_spill] sm:$0xff] %v1872_v62 }
 0x1c0   : > { %742 = vrot.lane.b32.xlu1 %v1785_v20, %s1503_s15  ;;  %450 = vrot.lane.b32.xlu2 %v1878_v0, %s1502_s14 }
 0x1c1   : > { %584 = vrot.lane.b32.xlu0 %v1768_v12, %s1501_s13 }
 0x1c2   : > { %v1887_v5 = vpop.permute.xlu1 %663  ;;  %v735_v6 = vpop.permute.xlu2 %734 }
 0x1c3   : > { %v589_v7 = vpop.permute.xlu0 %588 }
 0x1c4   : > { %v1891_v13 = vsel %vm604_vm5, %v589_v7, %v601_v36  ;;  %v1895_v14 = vsel %vm604_vm5, %v601_v36, %v589_v7  ;;  %v424_v7 = vand.u32 15, %v1706_v57  ;;  %v999_v57 = vld [vmem:[%s2578_s5 + $0x38] sm:$0xf] }
 0x1c5   : > { %2594 = vst [vmem:[#allocation11_spill] sm:$0xff] %v1891_v13 }
 0x1c6   : > { %vm1976_vm8 = vcmp.le.s32.totalorder %v424_v7, 14  ;;  %vm2094_vm9 = vcmp.ge.s32.totalorder %v424_v7, 1 }
 0x1c7   : > { %vm2150_vm11 = vmand %vm481_vm10, %vm1976_vm8 }
 0x1c8   : > { %586 = vrot.lane.b32.xlu1 %v1878_v0, %s1501_s13  ;;  %462 = vrot.lane.b32.xlu2 %v1897_v15, %s1502_s14  ;;  %vm2222_vm13 = vmand %vm481_vm10, %vm2094_vm9 }
 0x1c9   : > { %876 = vrot.lane.b32.xlu0 %v1785_v20, %s1504_s16 }
 0x1ca   : > { %v455_v54 = vpop.permute.xlu1 %454  ;;  %v583_v16 = vpop.permute.xlu2 %582 }
 0x1cb   : > { %v747_v17 = vpop.permute.xlu0 %746 }
 0x1cc   : > { %v1907_v21 = vsel %vm750_vm3, %v747_v17, %v735_v6  ;;  %v1911_v22 = vsel %vm750_vm3, %v735_v6, %v747_v17 }
 0x1cd   : > { %2596 = vst [vmem:[#allocation13_spill] sm:$0xff] %v1907_v21 }
 0x1ce   : > { %2597 = vst [vmem:[#allocation14_spill] sm:$0xff] %v1911_v22 }
 0x1d0   : > { %933 = vrot.lane.b32.xlu1 %v1632_v35, %s1508_s20  ;;  %521 = vrot.lane.b32.xlu2 %v1878_v0, %s1506_s18 }
 0x1d1   : > { %665 = vrot.lane.b32.xlu0 %v1785_v20, %s1505_s17 }
 0x1d2   : > { %v467_v23 = vpop.permute.xlu1 %466  ;;  %v875_v28 = vpop.permute.xlu2 %874 }
 0x1d3   : > { %v447_v29 = vpop.permute.xlu0 %446  ;;  %v1921_v32 = vsel %vm884_vm4, %v875_v28, %v863_v56  ;;  %v1925_v36 = vsel %vm468_vm1, %v467_v23, %v455_v54  ;;  %v1929_v37 = vsel %vm468_vm1, %v455_v54, %v467_v23  ;;  %v1933_v39 = vsel %vm884_vm4, %v863_v56, %v875_v28 }
 0x1d8   : > { %878 = vrot.lane.b32.xlu1 %v1897_v15, %s1504_s16  ;;  %598 = vrot.lane.b32.xlu2 %v1897_v15, %s1501_s13 }
 0x1d9   : > { %730 = vrot.lane.b32.xlu0 %v1768_v12, %s1503_s15 }
 0x1da   : > { %v526_v47 = vpop.permute.xlu1 %525  ;;  %v1941_v48 = vpop.permute.xlu2 %793 }
 0x1db   : > { %v459_v52 = vpop.permute.xlu0 %458 }
 0x1dc   : > { %v1945_v55 = vsel %vm468_vm1, %v459_v52, %v447_v29  ;;  %v1949_v56 = vsel %vm468_vm1, %v447_v29, %v459_v52 }
 0x1e0   : > { %655 = vrot.lane.b32.xlu1 %v1878_v0, %s1505_s17  ;;  %533 = vrot.lane.b32.xlu2 %v1897_v15, %s1506_s18 }
 0x1e1   : > { %866 = vrot.lane.b32.xlu0 %v1878_v0, %s1504_s16 }
 0x1e2   : > { %v1957_v58 = vpop.permute.xlu1 %882  ;;  %v538_v61 = vpop.permute.xlu2 %537 }
 0x1e3   : > { %v518_v3 = vpop.permute.xlu0 %517  ;;  %v1961_v4 = vsel %vm539_vm2, %v538_v61, %v526_v47  ;;  %v1965_v6 = vsel %vm539_vm2, %v526_v47, %v538_v61 }
 0x1e8   : > { %809 = vrot.lane.b32.xlu1 %v1897_v15, %s1507_s19  ;;  %667 = vrot.lane.b32.xlu2 %v1897_v15, %s1505_s17 }
 0x1e9   : > { %947 = vrot.lane.b32.xlu0 %v1690_v53, %s1508_s20 }
 0x1ea   : > { %v1974_v54 = vpop.permute.xlu1 %671  ;;  %v814_v17 = vpop.permute.xlu2 %813 }
 0x1eb   : > { %v729_v28 = vpop.permute.xlu0 %728 }
 0x1ec   : > { %v1983_v29 = vsel %vm750_vm3, %v1853_v46, %v729_v28  ;;  %v752_v47 = vsel %vm750_vm3, %v729_v28, %v1853_v46 }
 0x1ed   : > { %1401 = vmatpush.msk.msrb.mxu3 %vm1976_vm8, %v752_v47 }
 0x1ef   : > { %1402 = vmatpush.msk.msrb.mxu3 %vm1976_vm8, %v1758_v9 }
 0x1f0   : > { %732 = vrot.lane.b32.xlu1 %v1878_v0, %s1503_s15  ;;  %945 = vrot.lane.b32.xlu2 %v1640_v38, %s1508_s20 }
 0x1f1   : > { %797 = vrot.lane.b32.xlu0 %v1878_v0, %s1507_s19  ;;  %1140 = vmatpush.msrb.mxu3 %v1682_v49 }
 0x1f2   : > { %v802_v52 = vpop.permute.xlu1 %801  ;;  %v2000_v46 = vpop.permute.xlu2 %590 }
 0x1f3   : > { %v595_v61 = vpop.permute.xlu0 %594  ;;  %v2004_v28 = vsel %vm815_vm7, %v814_v17, %v802_v52  ;;  %1141 = vmatpush.msrb.mxu3 %v1632_v35  ;;  %v2009_v9 = vsel %vm815_vm7, %v802_v52, %v814_v17 }
 0x1f4   : > { %2600 = vst [vmem:[#allocation15_spill] sm:$0xff] %v2004_v28  ;;  %v2013_v47 = vsel %vm604_vm5, %v595_v61, %v583_v16  ;;  %v2017_v49 = vsel %vm604_vm5, %v583_v16, %v595_v61 }
 0x1f5   : > { %1142 = vmatpush.msrb.mxu3 %v1878_v0 }
 0x1f7   : > { %1143 = vmatpush.msrb.mxu3 %v1768_v12 }
 0x1f8   : > { %927 = vrot.lane.b32.xlu1 %v1668_v45, %s1508_s20  ;;  %744 = vrot.lane.b32.xlu2 %v1897_v15, %s1503_s15 }
 0x1f9   : > { %941 = vrot.lane.b32.xlu0 %v1785_v20, %s1508_s20  ;;  %1144 = vmatpush.msrb.mxu3 %v1668_v45 }
 0x1fa   : > { %v749_v35 = vpop.permute.xlu1 %748  ;;  %v2028_v17 = vpop.permute.xlu2 %935 }
 0x1fb   : > { %v530_v16 = vpop.permute.xlu0 %529  ;;  %1145 = vmatpush.msrb.mxu3 %v1616_v30 }
 0x1fc   : > { %v2033_v52 = vsel %vm539_vm2, %v530_v16, %v518_v3  ;;  %v2037_v61 = vsel %vm539_vm2, %v518_v3, %v530_v16 }
 0x200   : > { %943 = vrot.lane.b32.xlu1 %v1897_v15, %s1508_s20  ;;  %929 = vrot.lane.b32.xlu2 %v1768_v12, %s1508_s20 }
 0x201   : > { %931 = vrot.lane.b32.xlu0 %v1878_v0, %s1508_s20 }
 0x202   : > { %v449_v45 = vpop.permute.xlu1 %448  ;;  %v2045_v13 = vpop.permute.xlu2 %864 }
 0x203   : > { %v652_v24 = vpop.permute.xlu0 %651 }
 0x204   : > { %v2050_v21 = vsel %vm673_vm6, %v652_v24, %v1887_v5  ;;  %v2055_v3 = vsel %vm673_vm6, %v1887_v5, %v652_v24 }
 0x205   : > { %2601 = vst [vmem:[#allocation16_spill] sm:$0xff] %v2050_v21 }
 0x208   : > { %937 = vrot.lane.b32.xlu1 %v1618_v31, %s1508_s20  ;;  %939 = vrot.lane.b32.xlu2 %v1660_v42, %s1508_s20 }
 0x209   : > { %925 = vrot.lane.b32.xlu0 %v1616_v30, %s1508_s20 }
 0x20a   : > { %v461_v12 = vpop.permute.xlu1 %460  ;;  %v2063_v0 = vpop.permute.xlu2 %653 }
 0x20b   : > { %v806_v16 = vpop.permute.xlu0 %805  ;;  %v2067_v21 = vsel %vm468_vm1, %v461_v12, %v449_v45  ;;  %v2071_v24 = vsel %vm468_vm1, %v449_v45, %v461_v12 }
 0x20c   : > { %v2076_v5 = vsel %vm815_vm7, %v806_v16, %v1941_v48  ;;  %v2081_v30 = vsel %vm815_vm7, %v1941_v48, %v806_v16  ;;  %v2634_v48 = vld [vmem:[#allocation14_spill] sm:$0xff] }
 0x20d   : > { %2602 = vst [vmem:[#allocation17_spill] sm:$0xff] %v2076_v5 }
 0x20e   : > { %2603 = vst [vmem:[#allocation18_spill] sm:$0xff] %v2081_v30  ;;  %v431_v30 = vand.u32 15, %v2140_v34 }
 0x210   : > { %vm2154_vm12 = vcmp.le.s32.totalorder %v431_v30, 14  ;;  %vm2226_vm14 = vcmp.ge.s32.totalorder %v431_v30, 1  ;;  %v2629_v30 = vld [vmem:[#allocation8_spill] sm:$0xff] }
 0x212   : > { %v520_v33 = vpop.permute.xlu1 %519  ;;  %v2083_v50 = vpop.permute.xlu2 %807 }
 0x213   : > { %v871_v22 = vpop.permute.xlu0 %870 }
 0x214   : > { %v2088_v31 = vsel %vm884_vm4, %v1957_v58, %v871_v22  ;;  %v890_v45 = vsel %vm884_vm4, %v871_v22, %v1957_v58 }
 0x215   : > { %1161 = vmatpush.msrb.mxu0 %v890_v45 }
 0x217   : > { %1162 = vmatpush.msrb.mxu0 %v1845_v44 }
 0x21a   : > { %v597_v12 = vpop.permute.xlu1 %596  ;;  %v2103_v42 = vpop.permute.xlu2 %450 }
 0x21b   : > { %v660_v16 = vpop.permute.xlu0 %659 }
 0x21c   : > { %v2101_v5 = vsel %vm673_vm6, %v660_v16, %v1974_v54  ;;  %v685_v22 = vsel %vm673_vm6, %v1974_v54, %v660_v16 }
 0x21d   : > { %2606 = vst [vmem:[#allocation19_spill] sm:$0xff] %v2101_v5  ;;  %1403 = vmatpush.msk.msrb.mxu3 %vm2094_vm9, %v685_v22 }
 0x21f   : > { %1404 = vmatpush.msk.msrb.mxu3 %vm2094_vm9, %v1861_v51 }
 0x222   : > { %v532_v44 = vpop.permute.xlu1 %531  ;;  %v2121_v45 = vpop.permute.xlu2 %462 }
 0x223   : > { %v2113_v58 = vpop.permute.xlu0 %602 }
 0x224   : > { %v2119_v7 = vsel %vm604_vm5, %v2000_v46, %v2113_v58 }
 0x225   : > { %2607 = vst [vmem:[#allocation20_spill] sm:$0xff] %v2119_v7 }
 0x22a   : > { %v2123_v5 = vpop.permute.xlu1 %795  ;;  %v522_v7 = vpop.permute.xlu2 %521 }
 0x22b   : > { %2608 = vst [vmem:[#allocation21_spill] sm:$0xff] %v2123_v5  ;;  %v737_v54 = vpop.permute.xlu0 %736  ;;  %v2129_v16 = vsel %vm815_vm7, %v2083_v50, %v2123_v5 }
 0x22c   : > { %2609 = vst [vmem:[#allocation22_spill] sm:$0xff] %v2129_v16  ;;  %v2133_v51 = vsel %vm750_vm3, %v749_v35, %v737_v54  ;;  %v2137_v22 = vsel %vm750_vm3, %v737_v54, %v749_v35 }
 0x22d   : > { %2610 = vst [vmem:[#allocation23_spill] sm:$0xff] %v2133_v51  ;;  %v2636_v51 = vld [vmem:[#allocation17_spill] sm:$0xff] }
 0x22e   : > { %2611 = vst [vmem:[#allocation24_spill] sm:$0xff] %v2137_v22 }
 0x232   : > { %v2142_v62 = vpop.permute.xlu1 %742  ;;  %v599_v54 = vpop.permute.xlu2 %598 }
 0x233   : > { %2612 = vst [vmem:[#allocation25_spill] sm:$0xff] %v2142_v62  ;;  %v585_v20 = vpop.permute.xlu0 %584 }
 0x234   : > { %v613_v15 = vsel %vm604_vm5, %v597_v12, %v585_v20  ;;  %v607_v5 = vsel %vm604_vm5, %v585_v20, %v597_v12  ;;  %v2630_v12 = vld [vmem:[#allocation4_spill] sm:$0xff] }
 0x23a   : > { %v587_v16 = vpop.permute.xlu1 %586 }
 0x23b   : > { %v2158_v62 = vpop.permute.xlu0 %876  ;;  %v614_v22 = vsel %vm604_vm5, %v599_v54, %v587_v16  ;;  %v608_v28 = vsel %vm604_vm5, %v587_v16, %v599_v54  ;;  %v2635_v16 = vld [vmem:[#allocation19_spill] sm:$0xff]  ;;  %v2637_v54 = vld [vmem:[#allocation9_spill] sm:$0xff] }
 0x23c   : > { %1385 = vmatpush.msk.msrb.mxu2 %vm2150_vm11, %v614_v22  ;;  %1427 = vmatpush.msk.msrb.mxu1 %vm2154_vm12, %v608_v28 }
 0x23e   : > { %1386 = vmatpush.msk.msrb.mxu2 %vm2150_vm11, %v613_v15  ;;  %1428 = vmatpush.msk.msrb.mxu1 %vm2154_vm12, %v607_v5  ;;  %v534_v15 = vpop.permute.xlu2 %533 }
 0x240   : > { %1387 = vmatpush.msk.msrb.mxu2 %vm2150_vm11, %v2013_v47  ;;  %1429 = vmatpush.msk.msrb.mxu1 %vm2154_vm12, %v2017_v49 }
 0x242   : > { %v2182_v28 = vpop.permute.xlu1 %933  ;;  %1388 = vmatpush.msk.msrb.mxu2 %vm2150_vm11, %v1779_v18  ;;  %1430 = vmatpush.msk.msrb.mxu1 %vm2154_vm12, %v1783_v19  ;;  %v549_v18 = vsel %vm539_vm2, %v534_v15, %v522_v7  ;;  %v543_v19 = vsel %vm539_vm2, %v522_v7, %v534_v15  ;;  %v2632_v7 = vld [vmem:[#allocation3_spill] sm:$0xff] }
 0x243   : > { %v2190_v20 = vpop.permute.xlu0 %665  ;;  %v2638_v15 = vld [vmem:[#allocation7_spill] sm:$0xff] }
 0x244   : > { %1389 = vmatpush.msk.msrb.mxu2 %vm481_vm10, %v1961_v4  ;;  %1211 = vmatpush.msrb.mxu1 %v1965_v6  ;;  %v548_v4 = vsel %vm539_vm2, %v532_v44, %v520_v33  ;;  %v542_v6 = vsel %vm539_vm2, %v520_v33, %v532_v44  ;;  %v2631_v44 = vld [vmem:[#allocation24_spill] sm:$0xff]  ;;  %vm2458_vm2 = vmand %vm829_vm15, %vm2154_vm12 }
 0x246   : > { %1390 = vmatpush.msk.msrb.mxu2 %vm481_vm10, %v1833_v40  ;;  %1212 = vmatpush.msrb.mxu1 %v1837_v41  ;;  %v2234_v49 = vpop.permute.xlu2 %667 }
 0x248   : > { %1391 = vmatpush.msk.msrb.mxu2 %vm481_vm10, %v549_v18  ;;  %1213 = vmatpush.msrb.mxu1 %v543_v19  ;;  %v2639_v19 = vld [vmem:[#allocation25_spill] sm:$0xff] }
 0x24a   : > { %v879_v47 = vpop.permute.xlu1 %878  ;;  %1392 = vmatpush.msk.msrb.mxu2 %vm481_vm10, %v548_v4  ;;  %1214 = vmatpush.msrb.mxu1 %v542_v6 }
 0x24b   : > { %v2212_v40 = vpop.permute.xlu0 %730 }
 0x24c   : > { %1393 = vmatpush.msk.msrb.mxu2 %vm481_vm10, %v2033_v52  ;;  %1215 = vmatpush.msrb.mxu1 %v2037_v61  ;;  %v753_v4 = vsel %vm750_vm3, %v2212_v40, %v2639_v19 }
 0x24e   : > { %1394 = vmatpush.msk.msrb.mxu2 %vm481_vm10, %v1738_v1  ;;  %1216 = vmatpush.msrb.mxu1 %v1742_v2  ;;  %v478_v2 = vsel %vm468_vm1, %v2121_v45, %v2103_v42 }
 0x250   : > { %1395 = vmatpush.msk.msrb.mxu2 %vm2222_vm13, %v1925_v36  ;;  %1431 = vmatpush.msk.msrb.mxu1 %vm2226_vm14, %v1929_v37  ;;  %v682_v37 = vsel %vm673_vm6, %v2190_v20, %v2063_v0 }
 0x252   : > { %v2242_v52 = vpop.permute.xlu1 %655  ;;  %1396 = vmatpush.msk.msrb.mxu2 %vm2222_vm13, %v1804_v26  ;;  %1432 = vmatpush.msk.msrb.mxu1 %vm2226_vm14, %v1808_v27  ;;  %v472_v27 = vsel %vm468_vm1, %v2103_v42, %v2121_v45  ;;  %v887_v42 = vsel %vm884_vm4, %v2045_v13, %v2158_v62  ;;  %vm2382_vm1 = vmand %vm829_vm15, %vm2226_vm14  ;;  %v2633_v45 = vld [vmem:[#allocation22_spill] sm:$0xff] }
 0x253   : > { %v867_v1 = vpop.permute.xlu0 %866  ;;  %v683_v36 = vsel %vm673_vm6, %v2234_v49, %v2242_v52 }
 0x254   : > { %1397 = vmatpush.msk.msrb.mxu2 %vm2222_vm13, %v478_v2  ;;  %1405 = vmatpush.msk.msrb.mxu3 %vm2094_vm9, %v683_v36  ;;  %v888_v26 = vsel %vm884_vm4, %v867_v1, %v879_v47  ;;  %v2642_v2 = vld [vmem:[#allocation23_spill] sm:$0xff] }
 0x255   : > { %1163 = vmatpush.msrb.mxu0 %v888_v26  ;;  %1433 = vmatpush.msk.msrb.mxu1 %vm2226_vm14, %v472_v27  ;;  %v2644_v27 = vld [vmem:[#allocation16_spill] sm:$0xff] }
 0x256   : > { %1398 = vmatpush.msk.msrb.mxu2 %vm2222_vm13, %v2067_v21  ;;  %1406 = vmatpush.msk.msrb.mxu3 %vm2094_vm9, %v682_v37  ;;  %v2297_v21 = vpop.permute.xlu2 %945 }
 0x257   : > { %1164 = vmatpush.msrb.mxu0 %v887_v42  ;;  %1434 = vmatpush.msk.msrb.mxu1 %vm2226_vm14, %v2071_v24  ;;  %v759_v42 = vsel %vm750_vm3, %v2639_v19, %v2212_v40  ;;  %v995_v40 = vld [vmem:[%s2578_s5 + $0x18] sm:$0xff] }
 0x258   : > { %1399 = vmatpush.msk.msrb.mxu2 %vm2222_vm13, %v1945_v55  ;;  %1407 = vmatpush.msk.msrb.mxu3 %vm2094_vm9, %v2055_v3  ;;  %v616_v55 = vsel %vm604_vm5, %v2113_v58, %v2000_v46  ;;  %v2625_v46 = vld [vmem:[#allocation15_spill] sm:$0xff] }
 0x259   : > { %1165 = vmatpush.msrb.mxu0 %v1933_v39  ;;  %1435 = vmatpush.msk.msrb.mxu1 %vm2226_vm14, %v1949_v56 }
 0x25a   : > { %v810_v61 = vpop.permute.xlu1 %809  ;;  %1400 = vmatpush.msk.msrb.mxu2 %vm2222_vm13, %v1717_v59  ;;  %1408 = vmatpush.msk.msrb.mxu3 %vm2094_vm9, %v1800_v25  ;;  %v894_v25 = vsel %vm884_vm4, %v879_v47, %v867_v1  ;;  %v677_v47 = vsel %vm673_vm6, %v2242_v52, %v2234_v49  ;;  %v676_v49 = vsel %vm673_vm6, %v2063_v0, %v2190_v20  ;;  %v2643_v0 = vld [vmem:[#allocation13_spill] sm:$0xff] }
 0x25b   : > { %v2306_v39 = vpop.permute.xlu0 %947  ;;  %1166 = vmatpush.msrb.mxu0 %v1766_v11  ;;  %1436 = vmatpush.msk.msrb.mxu1 %vm2226_vm14, %v1721_v60  ;;  %v954_v60 = vsel %vm949_vm0, %v2182_v28, %v2297_v21  ;;  %v2346_v11 = vld [vmem:[%s2578_s5 + $0x8] sm:$0xff]  ;;  %v960_v52 = vsel %vm949_vm0, %v2297_v21, %v2182_v28 }
 0x25c   : > { %v955_v59 = vsel %vm949_vm0, %v2028_v17, %v2306_v39  ;;  %1409 = vmatpush.msk.msrb.mxu3 %vm2150_vm11, %v616_v55  ;;  %v961_v1 = vsel %vm949_vm0, %v2306_v39, %v2028_v17  ;;  %v994_v17 = vld [vmem:[%s2578_s5 + $0x10] sm:$0xff] }
 0x25d   : > { %1447 = vmatpush.msk.msra.mxu1 %vm829_vm15, %v2088_v31  ;;  %1411 = vmatpush.msk.msrb.mxu0 %vm2094_vm9, %v2009_v9  ;;  %v992_v31 = vld [vmem:[%s2578_s5] sm:$0xff]  ;;  %v2628_v9 = vld [vmem:[#allocation10_spill] sm:$0xff] }
 0x25e   : > { %1421 = vmatpush.msk.msra.mxu2 %vm1976_vm8, %v955_v59  ;;  %1410 = vmatpush.msk.msrb.mxu3 %vm2150_vm11, %v1895_v14  ;;  %v745_v56 = vpop.permute.xlu2 %744 }
 0x25f   : > { %1448 = vmatpush.msk.msra.mxu1 %vm829_vm15, %v1841_v43  ;;  %1412 = vmatpush.msk.msrb.mxu0 %vm2094_vm9, %v1876_v63  ;;  %v893_v43 = vsel %vm884_vm4, %v2158_v62, %v2045_v13 }
 0x260   : > { %1422 = vmatpush.msk.msra.mxu2 %vm1976_vm8, %v954_v60  ;;  %1437 = vmatpush.msk.msra.mxu3 %vm2154_vm12, %v1983_v29  ;;  %v2624_v29 = vld [vmem:[#allocation12_spill] sm:$0xff] }
 0x261   : > { %1449 = vmatpush.msk.msra.mxu1 %vm829_vm15, %v894_v25  ;;  %1131 = vmatmul.f32.vlgmr.msrb.gmra.mxu2 %v992_v31  ;;  %v998_v25 = vld [vmem:[%s2578_s5 + $0x30] sm:$0xf] }
 0x262   : > { %1154 = vmatmul.f32.vlgmr.msrb.gmra.mxu3 %v2346_v11  ;;  %v733_v63 = vpop.permute.xlu1 %732  ;;  %1223 = vmatmul.f32.vlgmr.msrb.gmra.mxu1 %v992_v31  ;;  %v2646_v31 = vld [vmem:[#allocation20_spill] sm:$0xff] }
 0x263   : > { %1438 = vmatpush.msk.msra.mxu3 %vm2154_vm12, %v1754_v8  ;;  %1450 = vmatpush.msk.msra.mxu1 %vm829_vm15, %v893_v43  ;;  %v798_v14 = vpop.permute.xlu0 %797  ;;  %v754_v22 = vsel %vm750_vm3, %v733_v63, %v745_v56  ;;  %v760_v20 = vsel %vm750_vm3, %v745_v56, %v733_v63  ;;  %vm1108_vm3 = vcmask 392192   ;;  %v2647_v43 = vld [vmem:[#allocation11_spill] sm:$0xff] }
 0x264   : > { %v819_v62 = vsel %vm815_vm7, %v798_v14, %v810_v61  ;;  %v825_v24 = vsel %vm815_vm7, %v810_v61, %v798_v14  ;;  %v2645_v61 = vld [vmem:[#allocation6_spill] sm:$0xff] }
 0x265   : > { %1232 = vmatpush.msra.mxu3 %v1690_v53  ;;  %1451 = vmatpush.msk.msra.mxu1 %vm829_vm15, %v1921_v32  ;;  %v2623_v53 = vld [vmem:[#allocation21_spill] sm:$0xff]  ;;  %v996_v32 = vld [vmem:[%s2578_s5 + $0x20] sm:$0xf] }
 0x266   : > { %1413 = vmatpush.msk.msrb.mxu0 %vm2094_vm9, %v819_v62  ;;  %v818_v13 = vsel %vm815_vm7, %v2623_v53, %v2083_v50  ;;  %v2627_v50 = vld [vmem:[#allocation5_spill] sm:$0xff]  ;;  %v930_v58 = vpop.permute.xlu2 %929 }
 0x267   : > { %1233 = vmatpush.msra.mxu3 %v1640_v38  ;;  %1452 = vmatpush.msk.msra.mxu1 %vm829_vm15, %v1762_v10  ;;  %v2406_v38 = vld [vmem:[%s2578_s5 + $0x28] sm:$0xf]  ;;  %v2626_v10 = vld [vmem:[#allocation18_spill] sm:$0xff] }
 0x268   : > { %1414 = vmatpush.msk.msrb.mxu0 %vm2094_vm9, %v818_v13 }
 0x269   : > { %1234 = vmatpush.msra.mxu3 %v2624_v29  ;;  %1453 = vmatpush.msk.msra.mxu1 %vm2382_vm1, %v2625_v46 }
 0x26a   : > { %1415 = vmatpush.msk.msrb.mxu0 %vm2094_vm9, %v2626_v10  ;;  %1134 = vmatmul.f32.gmra.mxu2 %v996_v32  ;;  %v928_v3 = vpop.permute.xlu1 %927 }
 0x26b   : > { %1235 = vmatpush.msra.mxu3 %v2627_v50  ;;  %1454 = vmatpush.msk.msra.mxu1 %vm2382_vm1, %v2628_v9  ;;  %v942_v5 = vpop.permute.xlu0 %941 }
 0x26c   : > { %1416 = vmatpush.msk.msrb.mxu0 %vm2094_vm9, %v2629_v30  ;;  %1157 = vmatmul.f32.gmra.mxu3 %v2406_v38  ;;  %v952_v36 = vsel %vm949_vm0, %v930_v58, %v942_v5  ;;  %v958_v21 = vsel %vm949_vm0, %v942_v5, %v930_v58 }
 0x26d   : > { %1236 = vmatpush.msra.mxu3 %v2630_v12  ;;  %1455 = vmatpush.msk.msra.mxu1 %vm2382_vm1, %v825_v24 }
 0x26e   : > { %1417 = vmatpush.msk.msrb.mxu0 %vm1976_vm8, %v2631_v44  ;;  %1226 = vmatmul.f32.gmra.mxu1 %v996_v32  ;;  %v940_v28 = vpop.permute.xlu2 %939 }
 0x26f   : > { %1237 = vmatpush.msra.mxu3 %v2632_v7  ;;  %1456 = vmatpush.msk.msra.mxu1 %vm2382_vm1, %v2633_v45  ;;  %v951_v37 = vsel %vm949_vm0, %v928_v3, %v940_v28  ;;  %v957_v59 = vsel %vm949_vm0, %v940_v28, %v928_v3 }
 0x270   : > { %1418 = vmatpush.msk.msrb.mxu0 %vm1976_vm8, %v2634_v48 }
 0x271   : > { %1439 = vmatpush.msk.msra.mxu3 %vm2226_vm14, %v2635_v16  ;;  %1457 = vmatpush.msk.msra.mxu1 %vm2382_vm1, %v2636_v51 }
 0x272   : > { %1419 = vmatpush.msk.msrb.mxu0 %vm1976_vm8, %v754_v22  ;;  %v944_v18 = vpop.permute.xlu1 %943 }
 0x273   : > { %1440 = vmatpush.msk.msra.mxu3 %vm2226_vm14, %v2637_v54  ;;  %1458 = vmatpush.msk.msra.mxu1 %vm2382_vm1, %v2638_v15  ;;  %v932_v41 = vpop.permute.xlu0 %931 }
 0x274   : > { %1420 = vmatpush.msk.msrb.mxu0 %vm1976_vm8, %v753_v4  ;;  %v953_v34 = vsel %vm949_vm0, %v932_v41, %v944_v18  ;;  %v959_v26 = vsel %vm949_vm0, %v944_v18, %v932_v41 }
 0x275   : > { %1441 = vmatpush.msk.msra.mxu3 %vm2226_vm14, %v677_v47  ;;  %1459 = vmatpush.msk.msra.mxu1 %vm2154_vm12, %v2642_v2 }
 0x276   : > { %1463 = vmatpush.msk.msra.mxu0 %vm2458_vm2, %v961_v1  ;;  %1423 = vmatpush.msk.msra.mxu2 %vm1976_vm8, %v953_v34 }
 0x277   : > { %1442 = vmatpush.msk.msra.mxu3 %vm2226_vm14, %v676_v49  ;;  %1460 = vmatpush.msk.msra.mxu1 %vm2154_vm12, %v2643_v0 }
 0x278   : > { %1464 = vmatpush.msk.msra.mxu0 %vm2458_vm2, %v960_v52  ;;  %1424 = vmatpush.msk.msra.mxu2 %vm1976_vm8, %v952_v36 }
 0x279   : > { %1177 = vmatmul.f32.vlgmr.msrb.gmra.mxu0 %v994_v17  ;;  %1443 = vmatpush.msk.msra.mxu3 %vm2226_vm14, %v2644_v27 }
 0x27a   : > { %1461 = vmatpush.msk.msra.mxu1 %vm2154_vm12, %v760_v20  ;;  %1465 = vmatpush.msk.msra.mxu0 %vm2458_vm2, %v959_v26  ;;  %v938_v39 = vpop.permute.xlu1 %937 }
 0x27b   : > { %1425 = vmatpush.msk.msra.mxu2 %vm1976_vm8, %v951_v37  ;;  %1444 = vmatpush.msk.msra.mxu3 %vm2226_vm14, %v2645_v61  ;;  %v926_v55 = vpop.permute.xlu0 %925 }
 0x27c   : > { %1462 = vmatpush.msk.msra.mxu1 %vm2154_vm12, %v759_v42  ;;  %1466 = vmatpush.msk.msra.mxu0 %vm2458_vm2, %v958_v21  ;;  %v950_v33 = vsel %vm949_vm0, %v926_v55, %v938_v39  ;;  %v956_v60 = vsel %vm949_vm0, %v938_v39, %v926_v55 }
 0x27d   : > { %1445 = vmatpush.msk.msra.mxu3 %vm2154_vm12, %v2646_v31  ;;  %1269 = vmatmul.f32.vlgmr.msra.gmra.mxu1 %v994_v17 }
 0x27e   : > { %1467 = vmatpush.msk.msra.mxu0 %vm2458_vm2, %v957_v59  ;;  %1426 = vmatpush.msk.msra.mxu2 %vm1976_vm8, %v950_v33 }
 0x27f   : > { %1378 = vmatmul.msk.f32.vlgmr.msra.gmra.mxu2 %vm1108_vm3, %v995_v40  ;;  %1446 = vmatpush.msk.msra.mxu3 %vm2154_vm12, %v2647_v43 }
 0x280   : > { %1468 = vmatpush.msk.msra.mxu0 %vm2458_vm2, %v956_v60  ;;  %1246 = vmatmul.f32.vlgmr.msra.gmra.mxu3 %v2346_v11 }
 0x281   : > { %1180 = vmatmul.f32.gmra.mxu0 %v998_v25 }
 0x285   : > { %1272 = vmatmul.f32.gmra.mxu1 %v998_v25 }
 0x287   : > { %1379 = vmatmul.msk.f32.gmra.mxu2 %vm1108_vm3, %v999_v57 }
 0x288   : > { %1249 = vmatmul.f32.gmra.mxu3 %v2406_v38 }
 0x289   : > { %1380 = vmatmul.msk.f32.vlgmr.msra.gmra.mxu0 %vm1108_vm3, %v995_v40 }
 0x291   : > { %1381 = vmatmul.msk.f32.gmra.mxu0 %vm1108_vm3, %v999_v57 }
 0x2df   : > { %v1224_v23 = vpop.f32.mrf.mxu1 }
 0x2e4   : > { %v1132_v35 = vpop.f32.mrf.mxu2 }
 0x2e5   : > { %v1155_v63 = vpop.f32.mrf.mxu3 }
 0x2e6   : > { %v1156_v8 = vadd.f32 %v1155_v63, %v1132_v35 }
 0x2eb   : > { %v1227_v11 = vpop.f32.mrf.mxu1 }
 0x2ed   : > { %v1135_v56 = vpop.f32.mrf.mxu2 }
 0x2ef   : > { %v1158_v62 = vpop.f32.mrf.mxu3 }
 0x2f0   : > { %v1159_v50 = vadd.f32 %v1158_v62, %v1135_v56 }
 0x2f6   : > { %v1178_v14 = vpop.f32.mrf.mxu0 }
 0x2f7   : > { %v1179_v13 = vadd.f32 %v1178_v14, %v1156_v8 }
 0x2fa   : > { %v1270_v32 = vpop.f32.mrf.mxu1 }
 0x2fe   : > { %v1181_v53 = vpop.f32.mrf.mxu0 }
 0x2ff   : > { %v1182_v5 = vadd.f32 %v1181_v53, %v1159_v50 }
 0x302   : > { %v1201_v29 = vpop.f32.mrf.mxu2  ;;  %v1273_v58 = vpop.f32.mrf.mxu1 }
 0x303   : > { %v1202_v46 = vadd.f32 %v1201_v29, %v1179_v13  ;;  %v1247_v38 = vpop.f32.mrf.mxu3 }
 0x304   : > { %v1248_v10 = vadd.f32 %v1247_v38, %v1224_v23 }
 0x305   : > { %1299 = vst [vmem:[%s1567_s12 + $0x10] sm:$0xff] %v1202_v46 }
 0x306   : > { %v1271_v9 = vadd.f32 %v1270_v32, %v1248_v10  ;;  %v1293_v3 = vpop.f32.mrf.mxu0 }
 0x308   : > { %v1294_v24 = vadd.f32 %v1293_v3, %v1271_v9 }
 0x30a   : > { %1300 = vst [vmem:[%s1567_s12 + $0x18] sm:$0xff] %v1294_v24  ;;  %v1204_v30 = vpop.f32.mrf.mxu2 }
 0x30b   : > { %v1205_v12 = vadd.f32 %v1204_v30, %v1182_v5  ;;  %v1250_v44 = vpop.f32.mrf.mxu3 }
 0x30c   : > { %v1251_v7 = vadd.f32 %v1250_v44, %v1227_v11 }
 0x30d   : > { %1301 = vst [vmem:[%s1567_s12 + $0x20] sm:$0xf] %v1205_v12 }
 0x30e   : > { %v1274_v45 = vadd.f32 %v1273_v58, %v1251_v7  ;;  %v1296_v48 = vpop.f32.mrf.mxu0 }
 0x310   : > { %v1297_v16 = vadd.f32 %v1296_v48, %v1274_v45 }
 0x312   : > { %1302 = vst [vmem:[%s1567_s12 + $0x28] sm:$0xf] %v1297_v16 }
 0x313 PF: > { %s16_s21 = sadd.s32 1, %s1498_s21  }
 0x314   : > { %p13_p4 = scmp.ge.s32.totalorder %s16_s21, 4  }
 0x316   :  { %15 = sbr.rel (!%p13_p4) target bundleno = 1 (0x1), region = 74 }

</bundles_post_ra>
